<compile_context>
chip_gen: v5e
topology: v5e:2x2
jax: 0.10.0
libtpu: 0.0.40
codegen_flags: <defaults>
</compile_context>

<pallas_src>
import functools
import math

import jax
import jax.numpy as jnp
from jax.experimental import pallas as pl
from jax.experimental.pallas import tpu as pltpu


# ----------------------------- small helpers --------------------------------
def _round_up(x, m):
    return ((x + m - 1) // m) * m


def _pick_tile(dim, max_tile, align):
    """Largest tile <= max_tile that divides `dim` and is a multiple of
    `align` (falls back to the full dim, which is always a legal block)."""
    if dim <= max_tile:
        return dim
    t = (max_tile // align) * align
    while t >= align:
        if dim % t == 0:
            return t
        t -= align
    return dim


def _divisors_desc(n):
    return [d for d in range(n, 0, -1) if n % d == 0]


@functools.lru_cache(maxsize=None)
def _roll_semantics(dtype_name):
    """Empirically pin down pltpu.roll's shift direction for `dtype`.

    Returns (use_roll, sign) such that
        pltpu.roll(x, shift=(sign * dx) % n, axis=-1)[i] == x[(i + dx) % n].
    Falls back to (False, 0) (unaligned-slice path) if the probe cannot run
    (e.g. unsupported dtype lowering, or we are being traced under jit).
    """
    dtype = jnp.dtype(dtype_name)
    n = 256
    try:
        def probe(o_ref):
            x = jax.lax.broadcasted_iota(jnp.int32, (8, n), 1).astype(dtype)
            o_ref[...] = pltpu.roll(x, shift=1, axis=1)

        r = pl.pallas_call(
            probe, out_shape=jax.ShapeDtypeStruct((8, n), dtype))()
        v = float(jax.device_get(r)[0, 0])
        if v == float(n - 1):      # jnp.roll semantics: result[i] = x[i - shift]
            return True, -1
        if v == 1.0:               # left-rotate semantics: result[i] = x[i + shift]
            return True, 1
    except Exception:
        pass
    return False, 0


@functools.lru_cache(maxsize=None)
def _hw_budget():
    """Generation-aware VMEM limit and reduction-tile depth."""
    try:
        cap = int(pltpu.get_tpu_info().vmem_capacity_bytes)
    except Exception:
        cap = 64 * 1024 * 1024                 # conservative (v7x per-core)
    vmem_limit = min(int(cap * 3 // 4), 112 * 1024 * 1024)
    vmem_limit = max(vmem_limit, 32 * 1024 * 1024)
    try:
        kind = jax.devices()[0].device_kind.lower()
    except Exception:
        kind = ""
    tci_max = 128 if "v5" in kind else 256     # v5e MXU K=128; v6e/v7x K=256
    return vmem_limit, tci_max


def _choose_spatial_tile(H, W, tci, tco, in_isz, budget):
    """Largest row-tile TH (divisor of H) whose VMEM footprint fits `budget`.
    Wp is chosen per-TH so that TH*Wp % 128 == 0 (lane-dense output stores)."""
    for th in _divisors_desc(H):
        a = 128 // math.gcd(th, 128)
        wp = _round_up(W + 2, a)
        lt, mt = th * wp, (th + 2) * wp
        fp = (2 * tci * mt * in_isz            # x block (double-buffered)
              + 2 * tco * lt * 4               # resident f32 output block
              + 4 * tci * lt * in_isz          # in-kernel shifted-slice temps
              + 2 * tco * lt * 4)              # matmul partials
        if fp <= budget:
            return th, wp
    return 1, _round_up(W + 2, 128)            # best effort


# ------------------------------- the kernel ---------------------------------
def _make_conv_kernel(Wp, Lt, use_roll, roll_sign):
    """Fused 3x3-conv (+bias, +ReLU) body.  Accumulates into the resident
    float32 output block across the ci (reduction) grid axis."""

    def kernel(x_ref, w_ref, b_ref, o_ref):
        ci = pl.program_id(3)
        n_ci = pl.num_programs(3)

        xf = x_ref[0, 0]                                  # (TCI, Mt_alloc)

        partial = None
        for dy in range(3):
            base = xf[:, dy * Wp: dy * Wp + Lt]           # aligned-ish dy slice
            for dx in range(3):
                if dx == 0:
                    xs = base
                elif use_roll:
                    # dx taps come from the dy slice via an XLU rotate; the
                    # wrapped lanes land only in cropped (>= W) columns.
                    xs = pltpu.roll(base, shift=(roll_sign * dx) % Lt, axis=1)
                else:
                    xs = xf[:, dy * Wp + dx: dy * Wp + dx + Lt]
                d = jnp.dot(w_ref[dy, dx], xs,
                            preferred_element_type=jnp.float32)
                partial = d if partial is None else partial + d

        @pl.when(ci == 0)
        def _init():
            o_ref[0, 0] = partial

        @pl.when(ci > 0)
        def _accumulate():
            o_ref[0, 0] += partial

        @pl.when(ci == n_ci - 1)
        def _finalize():
            o_ref[0, 0] = jnp.maximum(o_ref[0, 0] + b_ref[...], 0.0)

    return kernel


def conv3x3_bn_relu(x, w, b, bn, compute_dtype=jnp.bfloat16):
    """relu(BN(conv3x3(x) + b)), NCHW, inference-mode BatchNorm folded in."""
    B, Cin, H, W = x.shape
    Cout = w.shape[0]
    out_dtype = x.dtype

    # ---- fold inference-mode BatchNorm into the conv weight / bias ---------
    scale = bn["gamma"] / jnp.sqrt(bn["var"] + bn["eps"])          # (Cout,)
    w_f = w * scale[:, None, None, None]
    b_f = (b - bn["mean"]) * scale + bn["beta"]

    # ---- generation-aware tiling -------------------------------------------
    vmem_limit, tci_max = _hw_budget()
    TCO = _pick_tile(Cout, 256, 8)           # output-channel tile
    TCI = _pick_tile(Cin, tci_max, 128)      # input-channel (reduction) tile
    n_co, n_ci = Cout // TCO, Cin // TCI

    in_isz = jnp.dtype(compute_dtype).itemsize
    TH, Wp = _choose_spatial_tile(H, W, TCI, TCO, in_isz, vmem_limit // 2)
    n_th = H // TH
    Lt = TH * Wp                             # flattened output-tile length (%128==0)
    Mt = (TH + 2) * Wp                       # flattened input-tile length (with halo)
    Mt_alloc = _round_up(Mt + 2, 128)        # headroom for the no-roll fallback

    use_roll, roll_sign = _roll_semantics(jnp.dtype(compute_dtype).name)

    # ---- lane-dense, row-tiled (halo materialized) input layout ------------
    x_c = x.astype(compute_dtype)
    x_pad = jnp.pad(x_c, ((0, 0), (0, 0), (1, 1), (1, Wp - W - 1)))
    rows = jnp.arange(n_th)[:, None] * TH + jnp.arange(TH + 2)[None, :]
    x_tiles = x_pad[:, :, rows, :]                        # (B,Cin,n_th,TH+2,Wp)
    x_tiles = jnp.transpose(x_tiles, (0, 2, 1, 3, 4)).reshape(B, n_th, Cin, Mt)
    x_tiles = jnp.pad(x_tiles, ((0, 0), (0, 0), (0, 0), (0, Mt_alloc - Mt)))

    w_taps = jnp.transpose(w_f, (2, 3, 0, 1)).astype(compute_dtype)  # (3,3,Co,Ci)
    bias2d = b_f.reshape(Cout, 1).astype(jnp.float32)

    out_flat = pl.pallas_call(
        _make_conv_kernel(Wp, Lt, use_roll, roll_sign),
        out_shape=jax.ShapeDtypeStruct((B, n_th, Cout, Lt), jnp.float32),
        grid=(B, n_th, n_co, n_ci),
        in_specs=[
            pl.BlockSpec((1, 1, TCI, Mt_alloc),
                         lambda b_, t, co, ci: (b_, t, ci, 0)),
            pl.BlockSpec((3, 3, TCO, TCI),
                         lambda b_, t, co, ci: (0, 0, co, ci)),
            pl.BlockSpec((TCO, 1),
                         lambda b_, t, co, ci: (co, 0)),
        ],
        out_specs=pl.BlockSpec((1, 1, TCO, Lt),
                               lambda b_, t, co, ci: (b_, t, co, 0)),
        compiler_params=pltpu.CompilerParams(
            dimension_semantics=("parallel", "parallel", "parallel", "arbitrary"),
            vmem_limit_bytes=vmem_limit,
        ),
    )(x_tiles, w_taps, bias2d)

    # crop the over-complete columns / undo the row tiling (XLA glue)
    out = out_flat.reshape(B, n_th, Cout, TH, Wp)
    out = jnp.transpose(out, (0, 2, 1, 3, 4)).reshape(B, Cout, H, Wp)
    return out[:, :, :, :W].astype(out_dtype)


# ------------------------------ module forward ------------------------------
def _bilinear_upsample_x2(y):
    """Matches F.interpolate(scale_factor=2, mode='bilinear',
    align_corners=False) on NCHW input (pure data movement, kept in glue)."""
    def up_last(a):
        n = a.shape[-1]
        idx = jnp.arange(n)
        lo = a[..., jnp.maximum(idx - 1, 0)]
        hi = a[..., jnp.minimum(idx + 1, n - 1)]
        even = 0.75 * a + 0.25 * lo
        odd = 0.75 * a + 0.25 * hi
        return jnp.stack([even, odd], axis=-1).reshape(*a.shape[:-1], 2 * n)

    y = up_last(y)                                        # width
    y = up_last(y.swapaxes(-1, -2)).swapaxes(-1, -2)      # height
    return y


def smooth_fusion_forward(x, y, params, compute_dtype=jnp.bfloat16):
    """Pallas implementation of Smooth_Fusion.forward(x, y)."""
    p = params
    out = conv3x3_bn_relu(x, p["expand"]["w"], p["expand"]["b"],
                          p["expand"]["bn"], compute_dtype)
    # Residual added in glue: it fuses with the crop/reshape epilogue and
    # never occupies VMEM across the Cin reduction.
    if x.shape[1] == y.shape[1]:
        out = out + y
    else:
        out = out + _bilinear_upsample_x2(y)
    # TODO(synk): carry the padded/flattened layout between the three chained
    # layers (zeroing halo/wrap columns in the epilogue) to drop the two
    # inter-layer pad/crop passes.
    out = conv3x3_bn_relu(out, p["fusion1"]["w"], p["fusion1"]["b"],
                          p["fusion1"]["bn"], compute_dtype)
    out = conv3x3_bn_relu(out, p["fusion2"]["w"], p["fusion2"]["b"],
                          p["fusion2"]["bn"], compute_dtype)
    return out


# ----------------------------- pure-JAX reference ---------------------------
def _ref_block(x, w, b, bn):
    out = jax.lax.conv_general_dilated(
        x, w, window_strides=(1, 1), padding=((1, 1), (1, 1)),
        dimension_numbers=("NCHW", "OIHW", "NCHW"))
    out = out + b[None, :, None, None]
    scale = (bn["gamma"] / jnp.sqrt(bn["var"] + bn["eps"]))[None, :, None, None]
    out = (out - bn["mean"][None, :, None, None]) * scale \
        + bn["beta"][None, :, None, None]
    return jnp.maximum(out, 0.0)


def smooth_fusion_reference(x, y, params):
    e = _ref_block(x, params["expand"]["w"], params["expand"]["b"],
                   params["expand"]["bn"])
    if x.shape[1] == y.shape[1]:
        out = e + y
    else:
        out = e + _bilinear_upsample_x2(y)
    out = _ref_block(out, params["fusion1"]["w"], params["fusion1"]["b"],
                     params["fusion1"]["bn"])
    out = _ref_block(out, params["fusion2"]["w"], params["fusion2"]["b"],
                     params["fusion2"]["bn"])
    return out


def init_params(key, cexpand, cfusion):
    def conv_init(k, cout, cin):
        kw, kb = jax.random.split(k)
        w = 0.1 * jax.random.normal(kw, (cout, cin, 3, 3), jnp.float32)
        b = 0.1 * jax.random.normal(kb, (cout,), jnp.float32)
        return w, b

    def bn_init(k, c):
        k1, k2, k3, k4 = jax.random.split(k, 4)
        return dict(gamma=1.0 + 0.1 * jax.random.normal(k1, (c,), jnp.float32),
                    beta=0.1 * jax.random.normal(k2, (c,), jnp.float32),
                    mean=0.1 * jax.random.normal(k3, (c,), jnp.float32),
                    var=1.0 + 0.1 * jax.random.uniform(k4, (c,), jnp.float32),
                    eps=1e-5)

    ks = jax.random.split(key, 6)
    w0, b0 = conv_init(ks[0], cfusion, cexpand)   # expand : cexpand -> cfusion
    w1, b1 = conv_init(ks[1], cexpand, cfusion)   # fusion1: cfusion -> cexpand
    w2, b2 = conv_init(ks[2], cexpand, cexpand)   # fusion2: cexpand -> cexpand
    return {
        "expand":  {"w": w0, "b": b0, "bn": bn_init(ks[3], cfusion)},
        "fusion1": {"w": w1, "b": b1, "bn": bn_init(ks[4], cexpand)},
        "fusion2": {"w": w2, "b": b2, "bn": bn_init(ks[5], cexpand)},
    }


if __name__ == "__main__":
    key = jax.random.PRNGKey(0)
    k_x, k_y1, k_y2, k_p1, k_p2 = jax.random.split(key, 5)

    # Branch 2 of the forward: x/y channel counts differ -> bilinear x2 path.
    cexpand, cfusion = 4, 8
    x = jax.random.normal(k_x, (2, cexpand, 16, 16), jnp.float32)
    y = jax.random.normal(k_y1, (2, cfusion, 8, 8), jnp.float32)
    params = init_params(k_p1, cexpand, cfusion)
    ref = smooth_fusion_reference(x, y, params)

    # f32-MXU path: tight tolerance against the reference.
    out_f32 = smooth_fusion_forward(x, y, params, compute_dtype=jnp.float32)
    jax.block_until_ready(out_f32)
    assert out_f32.shape == (2, cexpand, 16, 16)
    assert jnp.allclose(out_f32, ref, atol=1e-4, rtol=1e-4), \
        float(jnp.max(jnp.abs(out_f32 - ref)))

    # bf16-MXU path (default, perf-oriented): looser tolerance.
    out_bf16 = smooth_fusion_forward(x, y, params)
    jax.block_until_ready(out_bf16)
    assert jnp.allclose(out_bf16, ref, atol=5e-2, rtol=5e-2), \
        float(jnp.max(jnp.abs(out_bf16 - ref)))

    # Branch 1 of the forward: equal channel counts -> plain residual add.
    cexpand2 = cfusion2 = 4
    y2 = jax.random.normal(k_y2, (2, cexpand2, 16, 16), jnp.float32)
    params2 = init_params(k_p2, cexpand2, cfusion2)
    out2 = smooth_fusion_forward(x, y2, params2, compute_dtype=jnp.float32)
    jax.block_until_ready(out2)
    ref2 = smooth_fusion_reference(x, y2, params2)
    assert jnp.allclose(out2, ref2, atol=1e-4, rtol=1e-4), \
        float(jnp.max(jnp.abs(out2 - ref2)))

    print("KERNEL_OK")
</pallas_src>

<mosaic_0001>
module attributes {stable_mosaic.version = 11 : i64} {
  func.func @kernel(%arg0: i32, %arg1: i32, %arg2: i32, %arg3: i32, %arg4: memref<1x1x4x512xf32, #tpu.memory_space<vmem>>, %arg5: memref<3x3x8x4xf32, #tpu.memory_space<vmem>>, %arg6: memref<8x1xf32, #tpu.memory_space<vmem>>, %arg7: memref<1x1x8x384xf32, #tpu.memory_space<vmem>>) attributes {dimension_semantics = [#tpu.dimension_semantics<parallel>, #tpu.dimension_semantics<parallel>, #tpu.dimension_semantics<parallel>, #tpu.dimension_semantics<arbitrary>], iteration_bounds = array<i64: 2, 1, 1, 1>, scalar_prefetch = 0 : i64, scratch_operands = 0 : i64, tpu.core_type = #tpu.core_type<tc>, window_params = [{transform_indices = @transform_0, window_bounds = array<i64: 1, 1, 4, 512>}, {transform_indices = @transform_1, window_bounds = array<i64: 3, 3, 8, 4>}, {transform_indices = @transform_2, window_bounds = array<i64: 8, 1>}, {transform_indices = @transform_3, window_bounds = array<i64: 1, 1, 8, 384>}]} {
    %c0 = arith.constant 0 : index
    %c0_0 = arith.constant 0 : index
    %c0_1 = arith.constant 0 : index
    %c0_2 = arith.constant 0 : index
    %0 = vector.load %arg4[%c0, %c0_0, %c0_1, %c0_2] : memref<1x1x4x512xf32, #tpu.memory_space<vmem>>, vector<1x1x4x512xf32>
    %1 = vector.shape_cast %0 : vector<1x1x4x512xf32> to vector<4x512xf32>
    %2 = vector.extract_strided_slice %1 {offsets = [0, 0], sizes = [4, 384], strides = [1, 1]} : vector<4x512xf32> to vector<4x384xf32>
    %c0_3 = arith.constant 0 : index
    %c0_4 = arith.constant 0 : index
    %c0_5 = arith.constant 0 : index
    %c0_6 = arith.constant 0 : index
    %3 = vector.load %arg5[%c0_3, %c0_4, %c0_5, %c0_6] : memref<3x3x8x4xf32, #tpu.memory_space<vmem>>, vector<1x1x8x4xf32>
    %4 = vector.shape_cast %3 : vector<1x1x8x4xf32> to vector<8x4xf32>
    %cst = arith.constant dense<0.000000e+00> : vector<8x384xf32>
    %5 = tpu.matmul %4, %2, %cst {dimension_numbers = #tpu.dot_dimension_numbers<[1], [0], [0], [1], [0, 0, 1, 1], [], []>} : vector<8x4xf32>, vector<4x384xf32>, vector<8x384xf32> -> vector<8x384xf32>
    %6 = vector.extract_strided_slice %1 {offsets = [0, 1], sizes = [4, 384], strides = [1, 1]} : vector<4x512xf32> to vector<4x384xf32>
    %c0_7 = arith.constant 0 : index
    %c1 = arith.constant 1 : index
    %c0_8 = arith.constant 0 : index
    %c0_9 = arith.constant 0 : index
    %7 = vector.load %arg5[%c0_7, %c1, %c0_8, %c0_9] : memref<3x3x8x4xf32, #tpu.memory_space<vmem>>, vector<1x1x8x4xf32>
    %8 = vector.shape_cast %7 : vector<1x1x8x4xf32> to vector<8x4xf32>
    %cst_10 = arith.constant dense<0.000000e+00> : vector<8x384xf32>
    %9 = tpu.matmul %8, %6, %cst_10 {dimension_numbers = #tpu.dot_dimension_numbers<[1], [0], [0], [1], [0, 0, 1, 1], [], []>} : vector<8x4xf32>, vector<4x384xf32>, vector<8x384xf32> -> vector<8x384xf32>
    %10 = arith.addf %5, %9 : vector<8x384xf32>
    %11 = vector.extract_strided_slice %1 {offsets = [0, 2], sizes = [4, 384], strides = [1, 1]} : vector<4x512xf32> to vector<4x384xf32>
    %c0_11 = arith.constant 0 : index
    %c2 = arith.constant 2 : index
    %c0_12 = arith.constant 0 : index
    %c0_13 = arith.constant 0 : index
    %12 = vector.load %arg5[%c0_11, %c2, %c0_12, %c0_13] : memref<3x3x8x4xf32, #tpu.memory_space<vmem>>, vector<1x1x8x4xf32>
    %13 = vector.shape_cast %12 : vector<1x1x8x4xf32> to vector<8x4xf32>
    %cst_14 = arith.constant dense<0.000000e+00> : vector<8x384xf32>
    %14 = tpu.matmul %13, %11, %cst_14 {dimension_numbers = #tpu.dot_dimension_numbers<[1], [0], [0], [1], [0, 0, 1, 1], [], []>} : vector<8x4xf32>, vector<4x384xf32>, vector<8x384xf32> -> vector<8x384xf32>
    %15 = arith.addf %10, %14 : vector<8x384xf32>
    %16 = vector.extract_strided_slice %1 {offsets = [0, 24], sizes = [4, 384], strides = [1, 1]} : vector<4x512xf32> to vector<4x384xf32>
    %c1_15 = arith.constant 1 : index
    %c0_16 = arith.constant 0 : index
    %c0_17 = arith.constant 0 : index
    %c0_18 = arith.constant 0 : index
    %17 = vector.load %arg5[%c1_15, %c0_16, %c0_17, %c0_18] : memref<3x3x8x4xf32, #tpu.memory_space<vmem>>, vector<1x1x8x4xf32>
    %18 = vector.shape_cast %17 : vector<1x1x8x4xf32> to vector<8x4xf32>
    %cst_19 = arith.constant dense<0.000000e+00> : vector<8x384xf32>
    %19 = tpu.matmul %18, %16, %cst_19 {dimension_numbers = #tpu.dot_dimension_numbers<[1], [0], [0], [1], [0, 0, 1, 1], [], []>} : vector<8x4xf32>, vector<4x384xf32>, vector<8x384xf32> -> vector<8x384xf32>
    %20 = arith.addf %15, %19 : vector<8x384xf32>
    %21 = vector.extract_strided_slice %1 {offsets = [0, 25], sizes = [4, 384], strides = [1, 1]} : vector<4x512xf32> to vector<4x384xf32>
    %c1_20 = arith.constant 1 : index
    %c1_21 = arith.constant 1 : index
    %c0_22 = arith.constant 0 : index
    %c0_23 = arith.constant 0 : index
    %22 = vector.load %arg5[%c1_20, %c1_21, %c0_22, %c0_23] : memref<3x3x8x4xf32, #tpu.memory_space<vmem>>, vector<1x1x8x4xf32>
    %23 = vector.shape_cast %22 : vector<1x1x8x4xf32> to vector<8x4xf32>
    %cst_24 = arith.constant dense<0.000000e+00> : vector<8x384xf32>
    %24 = tpu.matmul %23, %21, %cst_24 {dimension_numbers = #tpu.dot_dimension_numbers<[1], [0], [0], [1], [0, 0, 1, 1], [], []>} : vector<8x4xf32>, vector<4x384xf32>, vector<8x384xf32> -> vector<8x384xf32>
    %25 = arith.addf %20, %24 : vector<8x384xf32>
    %26 = vector.extract_strided_slice %1 {offsets = [0, 26], sizes = [4, 384], strides = [1, 1]} : vector<4x512xf32> to vector<4x384xf32>
    %c1_25 = arith.constant 1 : index
    %c2_26 = arith.constant 2 : index
    %c0_27 = arith.constant 0 : index
    %c0_28 = arith.constant 0 : index
    %27 = vector.load %arg5[%c1_25, %c2_26, %c0_27, %c0_28] : memref<3x3x8x4xf32, #tpu.memory_space<vmem>>, vector<1x1x8x4xf32>
    %28 = vector.shape_cast %27 : vector<1x1x8x4xf32> to vector<8x4xf32>
    %cst_29 = arith.constant dense<0.000000e+00> : vector<8x384xf32>
    %29 = tpu.matmul %28, %26, %cst_29 {dimension_numbers = #tpu.dot_dimension_numbers<[1], [0], [0], [1], [0, 0, 1, 1], [], []>} : vector<8x4xf32>, vector<4x384xf32>, vector<8x384xf32> -> vector<8x384xf32>
    %30 = arith.addf %25, %29 : vector<8x384xf32>
    %31 = vector.extract_strided_slice %1 {offsets = [0, 48], sizes = [4, 384], strides = [1, 1]} : vector<4x512xf32> to vector<4x384xf32>
    %c2_30 = arith.constant 2 : index
    %c0_31 = arith.constant 0 : index
    %c0_32 = arith.constant 0 : index
    %c0_33 = arith.constant 0 : index
    %32 = vector.load %arg5[%c2_30, %c0_31, %c0_32, %c0_33] : memref<3x3x8x4xf32, #tpu.memory_space<vmem>>, vector<1x1x8x4xf32>
    %33 = vector.shape_cast %32 : vector<1x1x8x4xf32> to vector<8x4xf32>
    %cst_34 = arith.constant dense<0.000000e+00> : vector<8x384xf32>
    %34 = tpu.matmul %33, %31, %cst_34 {dimension_numbers = #tpu.dot_dimension_numbers<[1], [0], [0], [1], [0, 0, 1, 1], [], []>} : vector<8x4xf32>, vector<4x384xf32>, vector<8x384xf32> -> vector<8x384xf32>
    %35 = arith.addf %30, %34 : vector<8x384xf32>
    %36 = vector.extract_strided_slice %1 {offsets = [0, 49], sizes = [4, 384], strides = [1, 1]} : vector<4x512xf32> to vector<4x384xf32>
    %c2_35 = arith.constant 2 : index
    %c1_36 = arith.constant 1 : index
    %c0_37 = arith.constant 0 : index
    %c0_38 = arith.constant 0 : index
    %37 = vector.load %arg5[%c2_35, %c1_36, %c0_37, %c0_38] : memref<3x3x8x4xf32, #tpu.memory_space<vmem>>, vector<1x1x8x4xf32>
    %38 = vector.shape_cast %37 : vector<1x1x8x4xf32> to vector<8x4xf32>
    %cst_39 = arith.constant dense<0.000000e+00> : vector<8x384xf32>
    %39 = tpu.matmul %38, %36, %cst_39 {dimension_numbers = #tpu.dot_dimension_numbers<[1], [0], [0], [1], [0, 0, 1, 1], [], []>} : vector<8x4xf32>, vector<4x384xf32>, vector<8x384xf32> -> vector<8x384xf32>
    %40 = arith.addf %35, %39 : vector<8x384xf32>
    %41 = vector.extract_strided_slice %1 {offsets = [0, 50], sizes = [4, 384], strides = [1, 1]} : vector<4x512xf32> to vector<4x384xf32>
    %c2_40 = arith.constant 2 : index
    %c2_41 = arith.constant 2 : index
    %c0_42 = arith.constant 0 : index
    %c0_43 = arith.constant 0 : index
    %42 = vector.load %arg5[%c2_40, %c2_41, %c0_42, %c0_43] : memref<3x3x8x4xf32, #tpu.memory_space<vmem>>, vector<1x1x8x4xf32>
    %43 = vector.shape_cast %42 : vector<1x1x8x4xf32> to vector<8x4xf32>
    %cst_44 = arith.constant dense<0.000000e+00> : vector<8x384xf32>
    %44 = tpu.matmul %43, %41, %cst_44 {dimension_numbers = #tpu.dot_dimension_numbers<[1], [0], [0], [1], [0, 0, 1, 1], [], []>} : vector<8x4xf32>, vector<4x384xf32>, vector<8x384xf32> -> vector<8x384xf32>
    %45 = arith.addf %40, %44 : vector<8x384xf32>
    %c0_i32 = arith.constant 0 : i32
    %46 = arith.cmpi eq, %arg3, %c0_i32 : i32
    %47 = arith.extui %46 : i1 to i32
    %c0_i32_45 = arith.constant 0 : i32
    %48 = arith.cmpi ne, %47, %c0_i32_45 : i32
    scf.if %48 {
      %c0_50 = arith.constant 0 : index
      %c0_51 = arith.constant 0 : index
      %c0_52 = arith.constant 0 : index
      %c0_53 = arith.constant 0 : index
      %55 = vector.load %arg7[%c0_50, %c0_51, %c0_52, %c0_53] : memref<1x1x8x384xf32, #tpu.memory_space<vmem>>, vector<1x1x8x384xf32>
      %56 = vector.shape_cast %55 : vector<1x1x8x384xf32> to vector<8x384xf32>
      %57 = vector.shape_cast %45 : vector<8x384xf32> to vector<1x1x8x384xf32>
      tpu.vector_store %arg7[%c0_50, %c0_51, %c0_52, %c0_53], %57 {strides = array<i32>} : memref<1x1x8x384xf32, #tpu.memory_space<vmem>>, vector<1x1x8x384xf32>,
    } else {
    }
    %c0_i32_46 = arith.constant 0 : i32
    %49 = arith.cmpi sgt, %arg3, %c0_i32_46 : i32
    %50 = arith.extui %49 : i1 to i32
    %c0_i32_47 = arith.constant 0 : i32
    %51 = arith.cmpi ne, %50, %c0_i32_47 : i32
    scf.if %51 {
      %c0_50 = arith.constant 0 : index
      %c0_51 = arith.constant 0 : index
      %c0_52 = arith.constant 0 : index
      %c0_53 = arith.constant 0 : index
      %55 = vector.load %arg7[%c0_50, %c0_51, %c0_52, %c0_53] : memref<1x1x8x384xf32, #tpu.memory_space<vmem>>, vector<1x1x8x384xf32>
      %56 = vector.shape_cast %55 : vector<1x1x8x384xf32> to vector<8x384xf32>
      %57 = arith.addf %56, %45 : vector<8x384xf32>
      %c0_54 = arith.constant 0 : index
      %c0_55 = arith.constant 0 : index
      %c0_56 = arith.constant 0 : index
      %c0_57 = arith.constant 0 : index
      %58 = vector.load %arg7[%c0_54, %c0_55, %c0_56, %c0_57] : memref<1x1x8x384xf32, #tpu.memory_space<vmem>>, vector<1x1x8x384xf32>
      %59 = vector.shape_cast %58 : vector<1x1x8x384xf32> to vector<8x384xf32>
      %60 = vector.shape_cast %57 : vector<8x384xf32> to vector<1x1x8x384xf32>
      tpu.vector_store %arg7[%c0_54, %c0_55, %c0_56, %c0_57], %60 {strides = array<i32>} : memref<1x1x8x384xf32, #tpu.memory_space<vmem>>, vector<1x1x8x384xf32>,
    } else {
    }
    %c0_i32_48 = arith.constant 0 : i32
    %52 = arith.cmpi eq, %arg3, %c0_i32_48 : i32
    %53 = arith.extui %52 : i1 to i32
    %c0_i32_49 = arith.constant 0 : i32
    %54 = arith.cmpi ne, %53, %c0_i32_49 : i32
    scf.if %54 {
      %c0_50 = arith.constant 0 : index
      %c0_51 = arith.constant 0 : index
      %c0_52 = arith.constant 0 : index
      %c0_53 = arith.constant 0 : index
      %55 = vector.load %arg7[%c0_50, %c0_51, %c0_52, %c0_53] : memref<1x1x8x384xf32, #tpu.memory_space<vmem>>, vector<1x1x8x384xf32>
      %56 = vector.shape_cast %55 : vector<1x1x8x384xf32> to vector<8x384xf32>
      %c0_54 = arith.constant 0 : index
      %c0_55 = arith.constant 0 : index
      %57 = vector.load %arg6[%c0_54, %c0_55] : memref<8x1xf32, #tpu.memory_space<vmem>>, vector<8x1xf32>
      %58 = vector.broadcast %57 : vector<8x1xf32> to vector<8x384xf32>
      %59 = arith.addf %56, %58 : vector<8x384xf32>
      %cst_56 = arith.constant 0.000000e+00 : f32
      %60 = vector.broadcast %cst_56 : f32 to vector<8x384xf32>
      %61 = arith.maximumf %59, %60 : vector<8x384xf32>
      %c0_57 = arith.constant 0 : index
      %c0_58 = arith.constant 0 : index
      %c0_59 = arith.constant 0 : index
      %c0_60 = arith.constant 0 : index
      %62 = vector.load %arg7[%c0_57, %c0_58, %c0_59, %c0_60] : memref<1x1x8x384xf32, #tpu.memory_space<vmem>>, vector<1x1x8x384xf32>
      %63 = vector.shape_cast %62 : vector<1x1x8x384xf32> to vector<8x384xf32>
      %64 = vector.shape_cast %61 : vector<8x384xf32> to vector<1x1x8x384xf32>
      tpu.vector_store %arg7[%c0_57, %c0_58, %c0_59, %c0_60], %64 {strides = array<i32>} : memref<1x1x8x384xf32, #tpu.memory_space<vmem>>, vector<1x1x8x384xf32>,
    } else {
    }
    return
  }
  func.func @transform_0(%arg0: i32, %arg1: i32, %arg2: i32, %arg3: i32) -> (i32, i32, i32, i32) {
    %c0_i32 = arith.constant 0 : i32
    %c0_i32_0 = arith.constant 0 : i32
    return %arg0, %arg1, %arg3, %c0_i32 : i32, i32, i32, i32
  }
  func.func @transform_1(%arg0: i32, %arg1: i32, %arg2: i32, %arg3: i32) -> (i32, i32, i32, i32) {
    %c0_i32 = arith.constant 0 : i32
    %c0_i32_0 = arith.constant 0 : i32
    %c0_i32_1 = arith.constant 0 : i32
    return %c0_i32, %c0_i32_0, %arg2, %arg3 : i32, i32, i32, i32
  }
  func.func @transform_2(%arg0: i32, %arg1: i32, %arg2: i32, %arg3: i32) -> (i32, i32) {
    %c0_i32 = arith.constant 0 : i32
    %c0_i32_0 = arith.constant 0 : i32
    return %arg2, %c0_i32 : i32, i32
  }
  func.func @transform_3(%arg0: i32, %arg1: i32, %arg2: i32, %arg3: i32) -> (i32, i32, i32, i32) {
    %c0_i32 = arith.constant 0 : i32
    %c0_i32_0 = arith.constant 0 : i32
    return %arg0, %arg1, %arg2, %c0_i32 : i32, i32, i32, i32
  }
}

</mosaic_0001>

<bundles_post_ra>
// kernel: tpu_custom_call.1
= control target key start
LH: loop header
LB: loop body
LE: loop exit
PB: predicated region body
PF: predicated region fallthrough
CT: control target
= control target key end

     0   :  { %8 = vsyncpa [#allocation3], 0  ;;  %s1766_s0 = inlined_call_operand.vmem [shape: f32[2,1,4,512], index: 0, kind: input, shape index: {}]   ;;  %s1767_s1 = inlined_call_operand.vmem [shape: f32[3,3,8,4], index: 1, kind: input, shape index: {}]   ;;  %s1768_s2 = inlined_call_operand.vmem [shape: f32[8,1], index: 2, kind: input, shape index: {}]   ;;  %s1769_s3 = inlined_call_operand.hbm [shape: f32[2,1,8,384], index: 3, kind: output, shape index: {}]  }
   0x1   :  { %10 = vsyncpa [#allocation3 + $0x1], 0  ;;  %s1535_s12 = smov 0   ;;  %s1537_s13 = smov 0  }
   0x2   :  { %s1539_s14 = smov 0   ;;  %s1541_s15 = smov 0  }
   0x3   :  { %s1543_s16 = smov 0   ;;  %s1545_s17 = smov 0  }
   0x4 LB: > { %s1283_s18 = sadd.s32 4294967295, %s1504_s17   ;;  %s1284_s19 = sadd.s32 4294967294, %s1504_s17   ;;  %s1504_s17 = sphi %s1545_s17, %s16_s17   ;;  %s1500_s16 = sphi %s1543_s16, %s1776_s16   ;;  %s1496_s15 = sphi %s1541_s15, %s1775_s15   ;;  %s1492_s14 = sphi %s1539_s14, %s1774_s14   ;;  %s1488_s13 = sphi %s1537_s13, %s1773_s13   ;;  %s1484_s12 = sphi %s1535_s12, %s1772_s12  }
   0x5   : > { %s42_s20 = sadd.s32 1, %s1500_s16  ;;  %s137_s21 = sadd.s32 1, %s1492_s14 }
   0x6   : > { %p44_p0 = scmp.ge.s32.totalorder %s42_s20, 2  ;;  %p147_p1 = scmp.ne.s32.totalorder %s1492_s14, %s1488_s13 }
   0x7   : > { %p148_p2 = scmp.eq.s32.totalorder %s1283_s18, 1  ;;  %p153_p3 = scmp.ne.s32.totalorder %s1488_s13, %s1484_s12 }
   0x8   : > { %s1778_s20 = smov (%p44_p0, %s42_s20), 0  ;;  %p154_p5 = scmp.eq.s32.totalorder %s1284_s19, 1 }
   0x9   : > { %p1575_p4 = por %p148_p2, %p147_p1  ;;  %s130_s23 = ssub.s32 %s1500_s16, %s1778_s20 }
   0xa   : > { %p1289_p6 = scmp.ge.s32.totalorder %s1504_s17, 1  ;;  %p135_p7 = scmp.eq.s32.totalorder %s130_s23, 0 }
   0xb   : > { %p1582_p8 = por %p154_p5, %p153_p3  ;;  %p205_p9 = scmp.lt.s32.totalorder %s1504_s17, 3 }
   0xc   : > { %s1588_s25 = scalar_select %p135_p7, %s1492_s14, %s137_s21  }
   0xd   : > { %p206_p10 = pnand %p1289_p6, %p205_p9 }
   0xe   : > { %p248_p11 = scmp.lt.s32.totalorder (!%p206_p10), %s1496_s15, 1  ;;  %s1506_s4 = smov (!%p206_p10), 127  }
   0xf   : > { %209 = sbr.rel (%p206_p10) target bundleno = 376 (0x178), region = 32  ;;  %s1507_s5 = smov (!%p206_p10), 126  }
  0x10   : > { %s1508_s6 = smov (!%p206_p10), 104   ;;  %s1509_s7 = smov (!%p206_p10), 103  }
  0x11   : > { %s1510_s8 = smov (!%p206_p10), 102   ;;  %s1511_s9 = smov (!%p206_p10), 80  }
  0x12   : > { %s1512_s10 = smov (!%p206_p10), 79   ;;  %s1513_s11 = smov (!%p206_p10), 78  }
  0x13   : > { %s245_s23 = sand.u32 (!%p206_p10), 1, %s1488_s13  }
  0x14   : > { %s249_s26 = scalar_select %p248_p11, %s1496_s15, 1  ;;  %vm302_vm0 = vcmask 1043456   ;;  %vm298_vm1 = vcmask 31744   ;;  %v274_v38 = vld [vmem:[%s1767_s1] sm:$0xff]  ;;  %vm294_vm2 = vcmask 1039360   ;;  %vm461_vm3 = vcmask 1031168  }
  0x15   : > { %v1292_v49 = vld [vmem:[%s1767_s1 + $0x8] sm:$0xff]  ;;  %vm554_vm4 = vcmask 850944   ;;  %v1305_v53 = vld [vmem:[%s1767_s1 + $0x10] sm:$0xff]  ;;  %v1312_v59 = vld [vmem:[%s1767_s1 + $0x18] sm:$0xff]  ;;  %vm647_vm5 = vcmask 842752   ;;  %vm740_vm6 = vcmask 834560  }
  0x16   : > { %s1357_s27 = sshll.u32 %s249_s26, 4  ;;  %vm833_vm7 = vcmask 654336   ;;  %vm926_vm8 = vcmask 646144   ;;  %vm1019_vm9 = vcmask 637952   ;;  %s1358_s26 = smul.u32 24, %s245_s23 }
  0x17   : > { %s260_s30 = scalar_lea.vmem %s1766_s0, %s1357_s27  ;;  %s1359_s27 = smul.u32 24, %s1496_s15 }
  0x18   : > { %v1595_v0 = vld [vmem:[%s260_s30 + $0x8] sm:$0xff]  ;;  %v1597_v1 = vld [vmem:[%s260_s30] sm:$0xff]  ;;  %s247_s15 = scalar_lea.vmem [#allocation2], %s1358_s26 }
  0x19   : > { %281 = vst [vmem:[#allocation1 + $0x10] ss:$2 sm:$0xff] %v1595_v0  ;;  %s1152_s30 = scalar_lea.hbm %s1769_s3, %s1359_s27 }
  0x1a   : > { %279 = vst [vmem:[#allocation1] ss:$2 sm:$0xff] %v1597_v1 }
  0x20   : > { %v284_v2 = vld.sshfl [vmem:[#allocation1 + $0x10] sm:$0xff pattern:$0x75316420]  ;;  %v285_v3 = vld.sshfl [vmem:[#allocation1 + $0x18] sm:$0xff pattern:$0x75316420] }
  0x21   : > { %290 = vrot.lane.b32.xlu0 %v284_v2, %s1506_s4  ;;  %v282_v4 = vld.sshfl [vmem:[#allocation1] sm:$0xff pattern:$0x75316420]  ;;  %371 = vst [vmem:[#allocation1 + $0x10] ss:$2 sm:$0xff] %v1595_v0 }
  0x22   : > { %286 = vrot.lane.b32.xlu1 %v282_v4, %s1506_s4  ;;  %v283_v5 = vld.sshfl [vmem:[#allocation1 + $0x8] sm:$0xff pattern:$0x75316420]  ;;  %v1319_v2 = vld [vmem:[%s1767_s1 + $0x20] sm:$0xff] }
  0x23   : > { %369 = vst [vmem:[#allocation1] ss:$2 sm:$0xff] %v1597_v1 }
  0x28   : > { %v1603_v6 = vld.sshfl [vmem:[#allocation1 + $0x10] sm:$0xff pattern:$0x75316420] }
  0x29   : > { %292 = vrot.lane.b32.xlu0 %v285_v3, %s1506_s4  ;;  %448 = vst [vmem:[#allocation1 + $0x10] ss:$2 sm:$0xff] %v1595_v0 }
  0x2a   : > { %288 = vrot.lane.b32.xlu1 %v283_v5, %s1506_s4  ;;  %v1606_v7 = vld.sshfl [vmem:[#allocation1] sm:$0xff pattern:$0x75316420]  ;;  %v1608_v8 = vld.sshfl [vmem:[#allocation1 + $0x8] sm:$0xff pattern:$0x75316420] }
  0x2b   : > { %446 = vst [vmem:[#allocation1] ss:$2 sm:$0xff] %v1597_v1  ;;  %1299 = vmatpush.msk.msra.mxu3 %vm302_vm0, %v1606_v7  ;;  %s1154_s4 = sshll.u32 %s247_s15, 4  ;;  %s1155_s4 = int_to_ptr.vmem [resolvable:$true] %s1154_s4 }
  0x2c   : > { %1300 = vmatmul.msk.f32.vlgmr.msra.gmra.mxu3 %vm298_vm1, %v274_v38 }
  0x30   : > { %v451_v9 = vld.sshfl [vmem:[#allocation1 + $0x10] sm:$0xff pattern:$0x75316420]  ;;  %v452_v10 = vld.sshfl [vmem:[#allocation1 + $0x18] sm:$0xff pattern:$0x75316420] }
  0x31   : > { %457 = vrot.lane.b32.xlu0 %v451_v9, %s1507_s5  ;;  %541 = vst [vmem:[#allocation1 + $0x10] ss:$2 sm:$0xff] %v1595_v0 }
  0x32   : > { %v449_v11 = vld.sshfl [vmem:[#allocation1] sm:$0xff pattern:$0x75316420]  ;;  %v450_v12 = vld.sshfl [vmem:[#allocation1 + $0x8] sm:$0xff pattern:$0x75316420] }
  0x33   : > { %453 = vrot.lane.b32.xlu2 %v449_v11, %s1507_s5  ;;  %539 = vst [vmem:[#allocation1] ss:$2 sm:$0xff] %v1597_v1 }
  0x38   : > { %v544_v13 = vld.sshfl [vmem:[#allocation1 + $0x10] sm:$0xff pattern:$0x75316420]  ;;  %v545_v14 = vld.sshfl [vmem:[#allocation1 + $0x18] sm:$0xff pattern:$0x75316420] }
  0x39   : > { %459 = vrot.lane.b32.xlu0 %v452_v10, %s1507_s5  ;;  %634 = vst [vmem:[#allocation1 + $0x10] ss:$2 sm:$0xff] %v1595_v0  ;;  %v1326_v10 = vld [vmem:[%s1767_s1 + $0x28] sm:$0xff] }
  0x3a   : > { %v543_v15 = vld.sshfl [vmem:[#allocation1 + $0x8] sm:$0xff pattern:$0x75316420]  ;;  %v542_v16 = vld.sshfl [vmem:[#allocation1] sm:$0xff pattern:$0x75316420] }
  0x3b   : > { %548 = vrot.lane.b32.xlu1 %v543_v15, %s1508_s6  ;;  %455 = vrot.lane.b32.xlu2 %v450_v12, %s1507_s5  ;;  %632 = vst [vmem:[#allocation1] ss:$2 sm:$0xff] %v1597_v1  ;;  %s1156_s5 = sshll.u32 %s1152_s30, 4  ;;  %s1157_s5 = int_to_ptr.hbm [resolvable:$true] %s1156_s5 }
  0x40   : > { %v637_v17 = vld.sshfl [vmem:[#allocation1 + $0x10] sm:$0xff pattern:$0x75316420]  ;;  %v638_v18 = vld.sshfl [vmem:[#allocation1 + $0x18] sm:$0xff pattern:$0x75316420] }
  0x41   : > { %643 = vrot.lane.b32.xlu0 %v637_v17, %s1509_s7  ;;  %727 = vst [vmem:[#allocation1 + $0x10] ss:$2 sm:$0xff] %v1595_v0  ;;  %v1333_v17 = vld [vmem:[%s1767_s1 + $0x30] sm:$0xff] }
  0x42   : > { %v635_v19 = vld.sshfl [vmem:[#allocation1] sm:$0xff pattern:$0x75316420]  ;;  %v636_v20 = vld.sshfl [vmem:[#allocation1 + $0x8] sm:$0xff pattern:$0x75316420] }
  0x43   : > { %546 = vrot.lane.b32.xlu1 %v542_v16, %s1508_s6  ;;  %550 = vrot.lane.b32.xlu2 %v544_v13, %s1508_s6  ;;  %725 = vst [vmem:[#allocation1] ss:$2 sm:$0xff] %v1597_v1 }
  0x48   : > { %v730_v21 = vld.sshfl [vmem:[#allocation1 + $0x10] sm:$0xff pattern:$0x75316420]  ;;  %v731_v22 = vld.sshfl [vmem:[#allocation1 + $0x18] sm:$0xff pattern:$0x75316420] }
  0x49   : > { %641 = vrot.lane.b32.xlu0 %v636_v20, %s1509_s7  ;;  %820 = vst [vmem:[#allocation1 + $0x10] ss:$2 sm:$0xff] %v1595_v0 }
  0x4a   : > { %v728_v23 = vld.sshfl [vmem:[#allocation1] sm:$0xff pattern:$0x75316420]  ;;  %v729_v24 = vld.sshfl [vmem:[#allocation1 + $0x8] sm:$0xff pattern:$0x75316420] }
  0x4b   : > { %645 = vrot.lane.b32.xlu1 %v638_v18, %s1509_s7  ;;  %552 = vrot.lane.b32.xlu2 %v545_v14, %s1508_s6  ;;  %818 = vst [vmem:[#allocation1] ss:$2 sm:$0xff] %v1597_v1  ;;  %s1137_s6 = scalar_lea.sflag [#allocation3], %s245_s23 }
  0x50   : > { %v823_v25 = vld.sshfl [vmem:[#allocation1 + $0x10] sm:$0xff pattern:$0x75316420]  ;;  %v824_v26 = vld.sshfl [vmem:[#allocation1 + $0x18] sm:$0xff pattern:$0x75316420] }
  0x51   : > { %738 = vrot.lane.b32.xlu0 %v731_v22, %s1510_s8  ;;  %913 = vst [vmem:[#allocation1 + $0x10] ss:$2 sm:$0xff] %v1595_v0  ;;  %v1121_v22 = vld [vmem:[%s1768_s2] sm:$0xff] }
  0x52   : > { %v822_v27 = vld.sshfl [vmem:[#allocation1 + $0x8] sm:$0xff pattern:$0x75316420]  ;;  %v821_v28 = vld.sshfl [vmem:[#allocation1] sm:$0xff pattern:$0x75316420] }
  0x53   : > { %732 = vrot.lane.b32.xlu1 %v728_v23, %s1510_s8  ;;  %639 = vrot.lane.b32.xlu2 %v635_v19, %s1509_s7  ;;  %911 = vst [vmem:[#allocation1] ss:$2 sm:$0xff] %v1597_v1  ;;  %v1340_v19 = vld [vmem:[%s1767_s1 + $0x38] sm:$0xff]  ;;  %v1514_v23 = vmov 0   ;;  %s1440_s7 = sshra.s32 %s1157_s5, 4  ;;  %s1441_s7 = int_to_ptr.hbm [resolvable:$true] %s1440_s7 }
  0x54   : > { %1424 = vset.pattern.permute.xlu2 %v1514_v23  ;;  %1425 = vset.pattern.permute.xlu0 %v1514_v23  ;;  %p1447_p1 = scmp.lt.s32.totalorder %s1441_s7, %s1769_s3 }
  0x58   : > { %v916_v29 = vld.sshfl [vmem:[#allocation1 + $0x10] sm:$0xff pattern:$0x75316420]  ;;  %v917_v30 = vld.sshfl [vmem:[#allocation1 + $0x18] sm:$0xff pattern:$0x75316420] }
  0x59   : > { %825 = vrot.lane.b32.xlu0 %v821_v28, %s1511_s9  ;;  %1006 = vst [vmem:[#allocation1 + $0x10] ss:$2 sm:$0xff] %v1595_v0 }
  0x5a   : > { %v915_v31 = vld.sshfl [vmem:[#allocation1 + $0x8] sm:$0xff pattern:$0x75316420]  ;;  %v914_v32 = vld.sshfl [vmem:[#allocation1] sm:$0xff pattern:$0x75316420] }
  0x5b   : > { %827 = vrot.lane.b32.xlu1 %v822_v27, %s1511_s9  ;;  %734 = vrot.lane.b32.xlu2 %v729_v24, %s1510_s8  ;;  %1004 = vst [vmem:[#allocation1] ss:$2 sm:$0xff] %v1597_v1 }
  0x60   : > { %v1009_v34 = vld.sshfl [vmem:[#allocation1 + $0x10] sm:$0xff pattern:$0x75316420]  ;;  %v1010_v36 = vld.sshfl [vmem:[#allocation1 + $0x18] sm:$0xff pattern:$0x75316420] }
  0x61   : > { %922 = vrot.lane.b32.xlu0 %v916_v29, %s1512_s10 }
  0x62   : > { %v1007_v33 = vld.sshfl [vmem:[#allocation1] sm:$0xff pattern:$0x75316420]  ;;  %v1008_v35 = vld.sshfl [vmem:[#allocation1 + $0x8] sm:$0xff pattern:$0x75316420] }
  0x63   : > { %829 = vrot.lane.b32.xlu1 %v823_v25, %s1511_s9  ;;  %736 = vrot.lane.b32.xlu2 %v730_v21, %s1510_s8  ;;  %s1442_s8 = scalar_lea.hbm %s1441_s7, 24 }
  0x64   : > { %p1443_p12 = scmp.ne.s32.totalorder %s1441_s7, %s1442_s8 }
  0x66   : > { %p1444_p13 = pnand %p1443_p12, %p1575_p4 }
  0x68   : > { %p1445_p0 = pneg %p1444_p13 }
  0x69   : > { %924 = vrot.lane.b32.xlu0 %v917_v30, %s1512_s10 }
  0x6b   : > { %831 = vrot.lane.b32.xlu1 %v824_v26, %s1511_s9  ;;  %920 = vrot.lane.b32.xlu2 %v915_v31, %s1512_s10 }
  0x71   : > { %1011 = vrot.lane.b32.xlu0 %v1007_v33, %s1513_s11 }
  0x73   : > { %1015 = vrot.lane.b32.xlu1 %v1009_v34, %s1513_s11  ;;  %918 = vrot.lane.b32.xlu2 %v914_v32, %s1512_s10  ;;  %v1347_v34 = vld [vmem:[%s1767_s1 + $0x40] sm:$0xff] }
  0x7b   : > { %1013 = vrot.lane.b32.xlu1 %v1008_v35, %s1513_s11  ;;  %1017 = vrot.lane.b32.xlu2 %v1010_v36, %s1513_s11  ;;  %s1446_s11 = scalar_lea.hbm %s1769_s3, 48 }
  0x7c   : > { %p1448_p2 = scmp.lt.s32.totalorder %s1446_s11, %s1442_s8 }
  0x7e   : > { %p1449_p3 = por %p1448_p2, %p1447_p1 }
  0x80   : > { %p1450_p5 = pnand %p1449_p3, %p1445_p0 }
  0x83   : > { %1124 = vperm.xlu2 %1424, %v1121_v22  }
  0x8d   : > { %v454_v37 = vpop.permute.xlu2 %453 }
  0x93   : > { %v291_v39 = vpop.permute.xlu0 %290 }
  0x94   : > { %v287_v40 = vpop.permute.xlu1 %286 }
  0x95   : > { %v456_v41 = vpop.permute.xlu2 %455 }
  0x96   : > { %v462_v45 = vsel %vm461_vm3, %v454_v37, %v456_v41 }
  0x9b   : > { %v293_v42 = vpop.permute.xlu0 %292 }
  0x9c   : > { %v289_v43 = vpop.permute.xlu1 %288  ;;  %v297_v44 = vsel %vm294_vm2, %v291_v39, %v293_v42 }
  0x9d   : > { %v295_v46 = vsel %vm294_vm2, %v287_v40, %v289_v43  ;;  %v296_v47 = vsel %vm294_vm2, %v289_v43, %v291_v39  ;;  %1297 = vmatpush.msk.msra.mxu2 %vm302_vm0, %v297_v44  ;;  %v551_v48 = vpop.permute.xlu2 %550 }
  0x9e   : > { %1293 = vmatpush.msk.msra.mxu0 %vm302_vm0, %v295_v46  ;;  %1295 = vmatpush.msk.msra.mxu1 %vm302_vm0, %v296_v47 }
  0x9f   : > { %1306 = vmatpush.msk.msrb.mxu2 %vm302_vm0, %v462_v45  ;;  %1294 = vmatmul.msk.f32.vlgmr.msra.gmra.mxu0 %vm298_vm1, %v1292_v49 }
  0xa0   : > { %1301 = vmatpush.msk.msrb.mxu0 %vm302_vm0, %v1608_v8  ;;  %1296 = vmatmul.msk.f32.vlgmr.msra.gmra.mxu1 %vm298_vm1, %v1292_v49 }
  0xa1   : > { %1298 = vmatmul.msk.f32.vlgmr.msra.gmra.mxu2 %vm298_vm1, %v1292_v49  ;;  %1303 = vmatpush.msk.msrb.mxu1 %vm302_vm0, %v1603_v6 }
  0xa3   : > { %v458_v50 = vpop.permute.xlu0 %457 }
  0xa4   : > { %v463_v51 = vsel %vm461_vm3, %v456_v41, %v458_v50 }
  0xa5   : > { %1308 = vmatpush.msk.msrb.mxu3 %vm302_vm0, %v463_v51  ;;  %v553_v52 = vpop.permute.xlu2 %552 }
  0xa6   : > { %v557_v54 = vsel %vm554_vm4, %v551_v48, %v553_v52  ;;  %1309 = vmatmul.msk.f32.vlgmr.msrb.gmra.mxu3 %vm298_vm1, %v1305_v53 }
  0xa7   : > { %1317 = vmatpush.msk.msra.mxu3 %vm302_vm0, %v557_v54  ;;  %1302 = vmatmul.msk.f32.vlgmr.msrb.gmra.mxu0 %vm298_vm1, %v274_v38 }
  0xa8   : > { %1304 = vmatmul.msk.f32.vlgmr.msrb.gmra.mxu1 %vm298_vm1, %v274_v38 }
  0xa9   : > { %1307 = vmatmul.msk.f32.vlgmr.msrb.gmra.mxu2 %vm298_vm1, %v1305_v53 }
  0xab   : > { %v460_v55 = vpop.permute.xlu0 %459 }
  0xac   : > { %v464_v56 = vsel %vm461_vm3, %v458_v50, %v460_v55 }
  0xad   : > { %v549_v57 = vpop.permute.xlu1 %548  ;;  %1310 = vmatpush.msk.msra.mxu0 %vm302_vm0, %v464_v56  ;;  %v640_v58 = vpop.permute.xlu2 %639 }
  0xae   : > { %v556_v60 = vsel %vm554_vm4, %v549_v57, %v551_v48  ;;  %1318 = vmatmul.msk.f32.vlgmr.msra.gmra.mxu3 %vm298_vm1, %v1312_v59 }
  0xaf   : > { %1315 = vmatpush.msk.msra.mxu2 %vm302_vm0, %v556_v60  ;;  %1311 = vmatmul.msk.f32.vlgmr.msra.gmra.mxu0 %vm298_vm1, %v1305_v53  ;;  %v401_v43 = vpop.f32.mrf.mxu3 }
  0xb1   : > { %1316 = vmatmul.msk.f32.vlgmr.msra.gmra.mxu2 %vm298_vm1, %v1312_v59 }
  0xb3   : > { %v644_v61 = vpop.permute.xlu0 %643 }
  0xb5   : > { %v547_v62 = vpop.permute.xlu1 %546  ;;  %v735_v63 = vpop.permute.xlu2 %734 }
  0xb6   : > { %v555_v0 = vsel %vm554_vm4, %v547_v62, %v549_v57 }
  0xb7   : > { %1313 = vmatpush.msk.msra.mxu1 %vm302_vm0, %v555_v0 }
  0xb8   : > { %1314 = vmatmul.msk.f32.vlgmr.msra.gmra.mxu1 %vm298_vm1, %v1312_v59 }
  0xbb   : > { %v642_v1 = vpop.permute.xlu0 %641 }
  0xbc   : > { %v648_v3 = vsel %vm647_vm5, %v640_v58, %v642_v1  ;;  %v649_v4 = vsel %vm647_vm5, %v642_v1, %v644_v61 }
  0xbd   : > { %v646_v5 = vpop.permute.xlu1 %645  ;;  %1322 = vmatpush.msk.msrb.mxu1 %vm302_vm0, %v649_v4  ;;  %1320 = vmatpush.msk.msrb.mxu0 %vm302_vm0, %v648_v3  ;;  %v737_v6 = vpop.permute.xlu2 %736 }
  0xbe   : > { %v650_v7 = vsel %vm647_vm5, %v644_v61, %v646_v5  ;;  %v742_v8 = vsel %vm740_vm6, %v735_v63, %v737_v6  ;;  %1321 = vmatmul.msk.f32.vlgmr.msrb.gmra.mxu0 %vm298_vm1, %v1319_v2 }
  0xbf   : > { %1324 = vmatpush.msk.msrb.mxu2 %vm302_vm0, %v650_v7  ;;  %1329 = vmatpush.msk.msra.mxu0 %vm302_vm0, %v742_v8 }
  0xc0   : > { %1323 = vmatmul.msk.f32.vlgmr.msrb.gmra.mxu1 %vm298_vm1, %v1319_v2  ;;  %1325 = vmatmul.msk.f32.vlgmr.msrb.gmra.mxu2 %vm298_vm1, %v1319_v2 }
  0xc3   : > { %v739_v9 = vpop.permute.xlu0 %738 }
  0xc4   : > { %v743_v11 = vsel %vm740_vm6, %v737_v6, %v739_v9 }
  0xc5   : > { %v733_v12 = vpop.permute.xlu1 %732  ;;  %v921_v13 = vpop.permute.xlu2 %920  ;;  %1331 = vmatpush.msk.msra.mxu1 %vm302_vm0, %v743_v11 }
  0xc6   : > { %v741_v14 = vsel %vm740_vm6, %v733_v12, %v735_v63  ;;  %1330 = vmatmul.msk.f32.vlgmr.msra.gmra.mxu0 %vm298_vm1, %v1326_v10 }
  0xc7   : > { %1327 = vmatpush.msk.msrb.mxu3 %vm302_vm0, %v741_v14 }
  0xc8   : > { %1328 = vmatmul.msk.f32.vlgmr.msrb.gmra.mxu3 %vm298_vm1, %v1326_v10  ;;  %1332 = vmatmul.msk.f32.vlgmr.msra.gmra.mxu1 %vm298_vm1, %v1326_v10 }
  0xcb   : > { %v826_v15 = vpop.permute.xlu0 %825 }
  0xcd   : > { %v828_v16 = vpop.permute.xlu1 %827  ;;  %v919_v18 = vpop.permute.xlu2 %918 }
  0xce   : > { %v834_v20 = vsel %vm833_vm7, %v826_v15, %v828_v16  ;;  %v927_v21 = vsel %vm926_vm8, %v919_v18, %v921_v13 }
  0xcf   : > { %1334 = vmatpush.msk.msra.mxu2 %vm302_vm0, %v834_v20  ;;  %1341 = vmatpush.msk.msrb.mxu1 %vm302_vm0, %v927_v21 }
  0xd0   : > { %1335 = vmatmul.msk.f32.vlgmr.msra.gmra.mxu2 %vm298_vm1, %v1333_v17  ;;  %1342 = vmatmul.msk.f32.vlgmr.msrb.gmra.mxu1 %vm298_vm1, %v1340_v19 }
  0xd3   : > { %v923_v24 = vpop.permute.xlu0 %922 }
  0xd4   : > { %v928_v25 = vsel %vm926_vm8, %v921_v13, %v923_v24 }
  0xd5   : > { %v830_v26 = vpop.permute.xlu1 %829  ;;  %1343 = vmatpush.msk.msrb.mxu2 %vm302_vm0, %v928_v25  ;;  %v1018_v32 = vpop.permute.xlu2 %1017 }
  0xd6   : > { %v835_v27 = vsel %vm833_vm7, %v828_v16, %v830_v26 }
  0xd7   : > { %1336 = vmatpush.msk.msra.mxu3 %vm302_vm0, %v835_v27 }
  0xd8   : > { %1337 = vmatmul.msk.f32.vlgmr.msra.gmra.mxu3 %vm298_vm1, %v1333_v17  ;;  %1344 = vmatmul.msk.f32.vlgmr.msrb.gmra.mxu2 %vm298_vm1, %v1340_v19 }
  0xdb   : > { %v925_v28 = vpop.permute.xlu0 %924 }
  0xdc   : > { %v929_v29 = vsel %vm926_vm8, %v923_v24, %v925_v28 }
  0xdd   : > { %v832_v30 = vpop.permute.xlu1 %831  ;;  %1345 = vmatpush.msk.msrb.mxu3 %vm302_vm0, %v929_v29  ;;  %v1125_v20 = vpop.permute.xlu2 %1124 }
  0xde   : > { %v836_v31 = vsel %vm833_vm7, %v830_v26, %v832_v30 }
  0xdf   : > { %1338 = vmatpush.msk.msrb.mxu0 %vm302_vm0, %v836_v31 }
  0xe0   : > { %1339 = vmatmul.msk.f32.vlgmr.msrb.gmra.mxu0 %vm298_vm1, %v1333_v17  ;;  %1346 = vmatmul.msk.f32.vlgmr.msrb.gmra.mxu3 %vm298_vm1, %v1340_v19 }
  0xe3   : > { %v1012_v36 = vpop.permute.xlu0 %1011 }
  0xe5   : > { %v1016_v33 = vpop.permute.xlu1 %1015 }
  0xe6   : > { %v1022_v35 = vsel %vm1019_vm9, %v1016_v33, %v1018_v32 }
  0xe7   : > { %1352 = vmatpush.msk.msra.mxu2 %vm302_vm0, %v1022_v35 }
  0xe8   : > { %1353 = vmatmul.msk.f32.vlgmr.msra.gmra.mxu2 %vm298_vm1, %v1347_v34 }
  0xed   : > { %v1014_v37 = vpop.permute.xlu1 %1013 }
  0xee   : > { %v1021_v38 = vsel %vm1019_vm9, %v1014_v37, %v1016_v33  ;;  %v1020_v39 = vsel %vm1019_vm9, %v1012_v36, %v1014_v37 }
  0xef   : > { %1348 = vmatpush.msk.msra.mxu0 %vm302_vm0, %v1020_v39  ;;  %1350 = vmatpush.msk.msra.mxu1 %vm302_vm0, %v1021_v38 }
  0xf0   : > { %1349 = vmatmul.msk.f32.vlgmr.msra.gmra.mxu0 %vm298_vm1, %v1347_v34  ;;  %1351 = vmatmul.msk.f32.vlgmr.msra.gmra.mxu1 %vm298_vm1, %v1347_v34 }
 0x11c   : > { %v326_v40 = vpop.f32.mrf.mxu0 }
 0x11d   : > { %v346_v41 = vpop.f32.mrf.mxu1  ;;  %v402_v58 = vadd.f32 %v401_v43, %v326_v40 }
 0x124   : > { %v366_v42 = vpop.f32.mrf.mxu2  ;;  %v421_v44 = vpop.f32.mrf.mxu0 }
 0x125   : > { %v441_v45 = vpop.f32.mrf.mxu1  ;;  %v422_v56 = vadd.f32 %v421_v44, %v346_v41 }
 0x126   : > { %v442_v57 = vadd.f32 %v441_v45, %v366_v42 }
 0x129   : > { %v511_v47 = vpop.f32.mrf.mxu3 }
 0x12a   : > { %v535_v59 = vadd.f32 %v511_v47, %v422_v56 }
 0x12c   : > { %v491_v46 = vpop.f32.mrf.mxu2  ;;  %v531_v48 = vpop.f32.mrf.mxu0 }
 0x12d   : > { %v536_v60 = vadd.f32 %v531_v48, %v442_v57  ;;  %v534_v62 = vadd.f32 %v491_v46, %v402_v58 }
 0x131   : > { %v624_v51 = vpop.f32.mrf.mxu3 }
 0x132   : > { %v629_v3 = vadd.f32 %v624_v51, %v536_v60 }
 0x134   : > { %v604_v50 = vpop.f32.mrf.mxu2 }
 0x135   : > { %v584_v49 = vpop.f32.mrf.mxu1  ;;  %v628_v2 = vadd.f32 %v604_v50, %v535_v59 }
 0x136   : > { %v627_v4 = vadd.f32 %v584_v49, %v534_v62 }
 0x13b   : > { %v677_v52 = vpop.f32.mrf.mxu0 }
 0x13c   : > { %v720_v8 = vadd.f32 %v677_v52, %v627_v4 }
 0x13d   : > { %v697_v53 = vpop.f32.mrf.mxu1 }
 0x13e   : > { %v721_v5 = vadd.f32 %v697_v53, %v628_v2 }
 0x143   : > { %v717_v54 = vpop.f32.mrf.mxu2  ;;  %v790_v63 = vpop.f32.mrf.mxu0 }
 0x144   : > { %v722_v6 = vadd.f32 %v717_v54, %v629_v3  ;;  %v814_v12 = vadd.f32 %v790_v63, %v721_v5 }
 0x145   : > { %v810_v0 = vpop.f32.mrf.mxu1 }
 0x146   : > { %v815_v13 = vadd.f32 %v810_v0, %v722_v6 }
 0x14b   : > { %v770_v55 = vpop.f32.mrf.mxu3 }
 0x14c   : > { %v813_v11 = vadd.f32 %v770_v55, %v720_v8 }
 0x14d   : > { %v956_v9 = vpop.f32.mrf.mxu1 }
 0x153   : > { %v863_v61 = vpop.f32.mrf.mxu2 }
 0x154   : > { %v906_v15 = vadd.f32 %v863_v61, %v813_v11 }
 0x156   : > { %v999_v21 = vadd.f32 %v956_v9, %v906_v15 }
 0x15b   : > { %v883_v1 = vpop.f32.mrf.mxu3  ;;  %v976_v7 = vpop.f32.mrf.mxu2 }
 0x15c   : > { %v907_v16 = vadd.f32 %v883_v1, %v814_v12 }
 0x15d   : > { %v903_v10 = vpop.f32.mrf.mxu0 }
 0x15e   : > { %v908_v17 = vadd.f32 %v903_v10, %v815_v13  ;;  %v1000_v22 = vadd.f32 %v976_v7, %v907_v16 }
 0x163   : > { %v996_v14 = vpop.f32.mrf.mxu3 }
 0x164   : > { %v1001_v18 = vadd.f32 %v996_v14, %v908_v17 }
 0x16b   : > { %v1089_v19 = vpop.f32.mrf.mxu2 }
 0x16c   : > { %v1094_v23 = vadd.f32 %v1089_v19, %v1001_v18 }
 0x16d   : > { %v1049_v24 = vpop.f32.mrf.mxu0  ;;  %v1069_v25 = vpop.f32.mrf.mxu1 }
 0x16e   : > { %v1092_v26 = vadd.f32 %v1049_v24, %v999_v21  ;;  %v1093_v27 = vadd.f32 %v1069_v25, %v1000_v22  ;;  %v1129_v28 = vadd.f32 %v1125_v20, %v1094_v23 }
 0x170   : > { %v1127_v29 = vadd.f32 %v1125_v20, %v1092_v26  ;;  %v1128_v30 = vadd.f32 %v1125_v20, %v1093_v27  ;;  %v1132_v31 = vmax.f32 %v1129_v28, 0.0 }
 0x172   : > { %v1130_v32 = vmax.f32 %v1127_v29, 0.0  ;;  %v1131_v33 = vmax.f32 %v1128_v30, 0.0  ;;  %1135 = vst [vmem:[%s247_s15 + $0x10] sm:$0xff] %v1132_v31 }
 0x174   : > { %1133 = vst [vmem:[%s247_s15] sm:$0xff] %v1130_v32 }
 0x175   : > { %1134 = vst [vmem:[%s247_s15 + $0x8] sm:$0xff] %v1131_v33 }
 0x176   : > { %1453 = shalt.err (!%p1450_p5)
}
 0x177   : > { %1360 = dma.vmem_to_hbm [thread:$0]  (%p1575_p4), %s1155_s4, 384, %s1157_s5, %s1137_s6  }
 0x178 PF: > { %p1366_p6 = scmp.ge.s32.totalorder %s1504_s17, 2  ;;  %s1168_s21 = sand.u32 1, %s1484_s12  }
 0x179   : > { %s1169_s23 = scalar_lea.sflag [#allocation3], %s1168_s21 }
 0x17a   : > { %p1363_p7 = pnand %p1366_p6, %p1582_p8 }
 0x17c   : > { %p1364_p9 = pneg %p1363_p7 }
 0x17e   : > { %1479 = dma.done.wait (%p1364_p9), %s1169_s23, 384  }
 0x17f   : > { %1481 = vsyncadd (%p1364_p9), %s1169_s23, 4294966912  ;;  %s16_s17 = sadd.s32 1, %s1504_s17   ;;  %s1772_s12 = smov %s1488_s13 }
 0x180   : > { %p13_p10 = scmp.ge.s32.totalorder %s16_s17, 4   ;;  %s1773_s13 = smov %s1492_s14 }
 0x181   : > { %s1774_s14 = smov %s1588_s25  ;;  %s1775_s15 = smov %s1500_s16 }
 0x182   : > { %s1776_s16 = smov %s1778_s20  ;;  %15 = sbr.rel (!%p13_p10) target bundleno = 4 (0x4), region = 102 }
 0x187   :  { %1175 = vsyncpa [#allocation3], 1 }
 0x188   :  { %1177 = vsyncpa [#allocation3 + $0x1], 1 }

</bundles_post_ra>
